<compile_context>
chip_gen: v5e
topology: v5e:2x2
jax: 0.10.0
libtpu: 0.0.40
codegen_flags: <defaults>
</compile_context>

<pallas_src>
import functools
from typing import NamedTuple

import jax
import jax.numpy as jnp
from jax.experimental import pallas as pl
from jax.experimental.pallas import tpu as pltpu


def _round_up(n: int, m: int) -> int:
    return ((n + m - 1) // m) * m


def _vmem_cap_bytes() -> int:
    """Generation-aware usable VMEM: physical capacity minus compiler headroom."""
    try:
        phys = int(pltpu.get_tpu_info().vmem_capacity_bytes)
    except Exception:  # non-TPU / older jax: conservative default
        phys = 64 << 20
    if phys > (32 << 20):
        return phys - (16 << 20)      # v5e/v6e: ~112 MiB, v7x: ~48 MiB
    return (phys * 3) // 4


class AdapterParams(NamedTuple):
    wd: jax.Array    # (E_pad, Mid_pad)  down weight, transposed, padded
    bd: jax.Array    # (1,  Mid_pad)     down bias, f32
    wu: jax.Array    # (Mid_pad, E_pad)  up weight, transposed, padded
    bu: jax.Array    # (1,  E_pad)       up bias, f32
    E: int
    Mid: int


def pack_adapter_params(w_down, b_down, w_up, b_up, *, weight_dtype=jnp.bfloat16):
    """One-time packing of torch-Linear-layout adapter weights.

    w_down: (Mid, E), w_up: (E, Mid).  Done once at param-load time so the
    transpose/cast/pad is not an extra HBM pass on every forward call.
    """
    Mid, E = w_down.shape
    assert w_up.shape == (E, Mid) and b_down.shape == (Mid,) and b_up.shape == (E,)
    E_pad, Mid_pad = _round_up(E, 128), _round_up(Mid, 128)

    w_dtype = jnp.dtype(weight_dtype)
    # v7x fallback: if resident f32 weights alone would blow the VMEM budget,
    # force bf16 weights (keeps the kernel MXU-bound instead of spill-bound).
    if w_dtype == jnp.float32 and 2 * E_pad * Mid_pad * 4 > _vmem_cap_bytes() - (8 << 20):
        w_dtype = jnp.dtype(jnp.bfloat16)
        # TODO(synk): alternatively stream weight tiles via a reduction grid
        # axis (pl.when-initialized accumulator) instead of forcing bf16.

    wd = jnp.pad(jnp.transpose(w_down).astype(w_dtype),
                 ((0, E_pad - E), (0, Mid_pad - Mid)))
    wu = jnp.pad(jnp.transpose(w_up).astype(w_dtype),
                 ((0, Mid_pad - Mid), (0, E_pad - E)))
    bd = jnp.pad(b_down.astype(jnp.float32), (0, Mid_pad - Mid)).reshape(1, Mid_pad)
    bu = jnp.pad(b_up.astype(jnp.float32), (0, E_pad - E)).reshape(1, E_pad)
    return AdapterParams(wd, bd, wu, bu, E, Mid)


def adapter_kernel(x_ref, wd_ref, bd_ref, wu_ref, bu_ref, o_ref, *, keep_h_f32):
    """One (tm, E_pad) row tile: out = x + up(relu(down(x)))."""
    x = x_ref[...]                                         # (tm, E_pad) activation dtype
    # Down-projection: bf16 (or f32) operands, f32 accumulation on the MXU.
    h = jnp.dot(x.astype(wd_ref.dtype), wd_ref[...],
                preferred_element_type=jnp.float32)
    h = jnp.maximum(h + bd_ref[...], 0.0)                  # bias + ReLU in f32 (VPU)
    # Up-projection.  Default: h downcast to the weight dtype (bf16) — a
    # deliberate precision trade; keep_h_f32=True keeps the LHS in f32.
    h_in = h if keep_h_f32 else h.astype(wu_ref.dtype)
    y = jnp.dot(h_in, wu_ref[...], preferred_element_type=jnp.float32)
    y = y + bu_ref[...]
    # Residual add in f32, cast back to the activation dtype.
    o_ref[...] = (x.astype(jnp.float32) + y).astype(o_ref.dtype)


def adapter_forward(x, params: AdapterParams, *, tm: int = 1024, keep_h_f32: bool = False):
    """x: (..., E) activations (f32 or bf16).  params: pack_adapter_params output."""
    orig_shape = x.shape
    E, Mid = params.E, params.Mid
    assert orig_shape[-1] == E
    E_pad, Mid_pad = params.wd.shape
    assert params.wu.shape == (Mid_pad, E_pad)

    x2 = x.reshape(-1, E)
    M = x2.shape[0]

    a_bytes = jnp.dtype(x2.dtype).itemsize
    w_bytes = jnp.dtype(params.wd.dtype).itemsize
    sub = 16 if x2.dtype == jnp.bfloat16 else 8            # sublane granularity

    # Zero-pad the contraction/lane dim only (must be real zeros: padded weight
    # rows are zero, but garbage x lanes could be NaN/Inf -> 0*NaN poisons rows).
    if E_pad != E:
        x2 = jnp.pad(x2, ((0, 0), (0, E_pad - E)))

    # ---- VMEM budget & row-tile selection (generation-aware) ----------------
    cap = _vmem_cap_bytes()
    weight_vmem = 2 * E_pad * Mid_pad * w_bytes + (Mid_pad + E_pad) * 4   # Buffered(1)

    def footprint(t):
        io = 2 * (2 * t * E_pad * a_bytes)                  # x + out, double-buffered
        temps = t * (10 * E_pad + 6 * Mid_pad)              # f32/bf16 in-kernel temporaries
        return weight_vmem + io + temps

    # Largest row tile <= requested that (a) covers M and (b) fits the budget.
    tm = max(sub, _round_up(min(tm, max(M, 1)), sub))
    while tm > sub and footprint(tm) > cap:
        tm = max(sub, _round_up(tm // 2, sub))
    vmem_limit = int(max(min(footprint(tm) + (2 << 20), cap), 8 << 20))

    grid = (pl.cdiv(M, tm),)                                # partial last block masked
    const_map = lambda i: (0, 0)

    out = pl.pallas_call(
        functools.partial(adapter_kernel, keep_h_f32=keep_h_f32),
        out_shape=jax.ShapeDtypeStruct((M, E_pad), x2.dtype),
        grid_spec=pltpu.PrefetchScalarGridSpec(
            num_scalar_prefetch=0,
            grid=grid,
            in_specs=[
                pl.BlockSpec((tm, E_pad), lambda i: (i, 0)),                              # x row tile (streamed)
                pl.BlockSpec((E_pad, Mid_pad), const_map, pipeline_mode=pl.Buffered(1)),  # down weight (resident)
                pl.BlockSpec((1, Mid_pad), const_map, pipeline_mode=pl.Buffered(1)),      # down bias
                pl.BlockSpec((Mid_pad, E_pad), const_map, pipeline_mode=pl.Buffered(1)),  # up weight (resident)
                pl.BlockSpec((1, E_pad), const_map, pipeline_mode=pl.Buffered(1)),        # up bias
            ],
            out_specs=pl.BlockSpec((tm, E_pad), lambda i: (i, 0)),
        ),
        compiler_params=pltpu.CompilerParams(
            dimension_semantics=("parallel",),   # row tiles shard across v7x's two TCs
            vmem_limit_bytes=vmem_limit,
        ),
    )(x2, params.wd, params.bd, params.wu, params.bu)

    return out[:, :E].reshape(orig_shape)


def _reference(x, w_down, b_down, w_up, b_up):
    h = jnp.maximum(x @ w_down.T + b_down, 0.0)
    return x + (h @ w_up.T + b_up)


if __name__ == "__main__":
    # C_ResNet applies the adapter to the flattened avg-pool output, i.e.
    # x has shape (batch, end_features).  Small test: batch=16, end_features=32,
    # mid_features = end_features // 2 = 16.
    B, E = 16, 32
    Mid = E // 2

    key = jax.random.PRNGKey(0)
    kx, kwd, kbd, kwu, kbu = jax.random.split(key, 5)

    x = jax.random.normal(kx, (B, E), dtype=jnp.float32)
    # Mirror the module init: normal(0, 0.01) weights, torch-Linear-style bias.
    w_down = 0.01 * jax.random.normal(kwd, (Mid, E), dtype=jnp.float32)
    b_down = jax.random.uniform(kbd, (Mid,), minval=-1.0 / jnp.sqrt(E),
                                maxval=1.0 / jnp.sqrt(E), dtype=jnp.float32)
    w_up = 0.01 * jax.random.normal(kwu, (E, Mid), dtype=jnp.float32)
    b_up = jax.random.uniform(kbu, (E,), minval=-1.0 / jnp.sqrt(Mid),
                              maxval=1.0 / jnp.sqrt(Mid), dtype=jnp.float32)

    ref = _reference(x, w_down, b_down, w_up, b_up)

    # Parameters packed once (transpose/cast/pad hoisted out of the forward path).
    p_bf16 = pack_adapter_params(w_down, b_down, w_up, b_up, weight_dtype=jnp.bfloat16)
    p_f32 = pack_adapter_params(w_down, b_down, w_up, b_up, weight_dtype=jnp.float32)

    # 1) Default path: bf16 MXU datapath, f32 accumulation, single grid step.
    out = jax.block_until_ready(adapter_forward(x, p_bf16))
    assert out.shape == x.shape
    assert jnp.allclose(out, ref, atol=3e-2, rtol=3e-2), "bf16 path mismatch"

    # 2) f32 weights, small tm -> multi-step grid (exercises row tiling).
    out_f32 = jax.block_until_ready(adapter_forward(x, p_f32, tm=8))
    assert jnp.allclose(out_f32, ref, atol=1e-5, rtol=1e-5), "f32 path mismatch"

    # 3) Ragged row count with tm=8 -> masked partial last block (no M pad copy).
    out_r = jax.block_until_ready(adapter_forward(x[:13], p_f32, tm=8))
    assert jnp.allclose(out_r, ref[:13], atol=1e-5, rtol=1e-5), "ragged-M mismatch"

    # 4) bf16 activation streaming end-to-end (halves HBM traffic).
    out_bfx = jax.block_until_ready(adapter_forward(x.astype(jnp.bfloat16), p_bf16))
    assert out_bfx.dtype == jnp.bfloat16
    assert jnp.allclose(out_bfx.astype(jnp.float32), ref, atol=5e-2, rtol=5e-2), \
        "bf16-activation path mismatch"

    # 5) keep_h_f32 option (f32 LHS for the up-projection, precision-sensitive models).
    out_hf = jax.block_until_ready(adapter_forward(x, p_bf16, keep_h_f32=True))
    assert jnp.allclose(out_hf, ref, atol=3e-2, rtol=3e-2), "keep_h_f32 path mismatch"

    # TODO(synk): the frozen ResNet conv/bn/pool backbone and final linear of
    # C_ResNet are left to standard JAX/XLA; only the adapter is fused here.
    print("KERNEL_OK")
</pallas_src>

<mosaic_0001>
module attributes {stable_mosaic.version = 11 : i64} {
  func.func @adapter_kernel(%arg0: i32, %arg1: memref<16x128xf32, #tpu.memory_space<vmem>>, %arg2: memref<128x128xbf16, #tpu.memory_space<vmem>>, %arg3: memref<1x128xf32, #tpu.memory_space<vmem>>, %arg4: memref<128x128xbf16, #tpu.memory_space<vmem>>, %arg5: memref<1x128xf32, #tpu.memory_space<vmem>>, %arg6: memref<16x128xf32, #tpu.memory_space<vmem>>) attributes {dimension_semantics = [#tpu.dimension_semantics<parallel>], iteration_bounds = array<i64: 1>, scalar_prefetch = 0 : i64, scratch_operands = 0 : i64, tpu.core_type = #tpu.core_type<tc>, window_params = [{transform_indices = @transform_0, window_bounds = array<i64: 16, 128>}, {pipeline_mode = #tpu.pipeline_mode<synchronous>, transform_indices = @transform_1, window_bounds = array<i64: 128, 128>}, {pipeline_mode = #tpu.pipeline_mode<synchronous>, transform_indices = @transform_2, window_bounds = array<i64: 1, 128>}, {pipeline_mode = #tpu.pipeline_mode<synchronous>, transform_indices = @transform_3, window_bounds = array<i64: 128, 128>}, {pipeline_mode = #tpu.pipeline_mode<synchronous>, transform_indices = @transform_4, window_bounds = array<i64: 1, 128>}, {transform_indices = @transform_5, window_bounds = array<i64: 16, 128>}]} {
    %c0 = arith.constant 0 : index
    %c0_0 = arith.constant 0 : index
    %0 = vector.load %arg1[%c0, %c0_0] : memref<16x128xf32, #tpu.memory_space<vmem>>, vector<16x128xf32>
    %1 = arith.truncf %0 : vector<16x128xf32> to vector<16x128xbf16>
    %c0_1 = arith.constant 0 : index
    %c0_2 = arith.constant 0 : index
    %2 = vector.load %arg2[%c0_1, %c0_2] : memref<128x128xbf16, #tpu.memory_space<vmem>>, vector<128x128xbf16>
    %cst = arith.constant dense<0.000000e+00> : vector<16x128xf32>
    %3 = tpu.matmul %1, %2, %cst {dimension_numbers = #tpu.dot_dimension_numbers<[1], [0], [0], [1], [0, 0, 1, 1], [], []>} : vector<16x128xbf16>, vector<128x128xbf16>, vector<16x128xf32> -> vector<16x128xf32>
    %c0_3 = arith.constant 0 : index
    %c0_4 = arith.constant 0 : index
    %4 = vector.load %arg3[%c0_3, %c0_4] : memref<1x128xf32, #tpu.memory_space<vmem>>, vector<1x128xf32>
    %5 = vector.broadcast %4 : vector<1x128xf32> to vector<16x128xf32>
    %6 = arith.addf %3, %5 : vector<16x128xf32>
    %cst_5 = arith.constant 0.000000e+00 : f32
    %7 = vector.broadcast %cst_5 : f32 to vector<16x128xf32>
    %8 = arith.maximumf %6, %7 : vector<16x128xf32>
    %9 = arith.truncf %8 : vector<16x128xf32> to vector<16x128xbf16>
    %c0_6 = arith.constant 0 : index
    %c0_7 = arith.constant 0 : index
    %10 = vector.load %arg4[%c0_6, %c0_7] : memref<128x128xbf16, #tpu.memory_space<vmem>>, vector<128x128xbf16>
    %cst_8 = arith.constant dense<0.000000e+00> : vector<16x128xf32>
    %11 = tpu.matmul %9, %10, %cst_8 {dimension_numbers = #tpu.dot_dimension_numbers<[1], [0], [0], [1], [0, 0, 1, 1], [], []>} : vector<16x128xbf16>, vector<128x128xbf16>, vector<16x128xf32> -> vector<16x128xf32>
    %c0_9 = arith.constant 0 : index
    %c0_10 = arith.constant 0 : index
    %12 = vector.load %arg5[%c0_9, %c0_10] : memref<1x128xf32, #tpu.memory_space<vmem>>, vector<1x128xf32>
    %13 = vector.broadcast %12 : vector<1x128xf32> to vector<16x128xf32>
    %14 = arith.addf %11, %13 : vector<16x128xf32>
    %15 = arith.addf %0, %14 : vector<16x128xf32>
    %c0_11 = arith.constant 0 : index
    %c0_12 = arith.constant 0 : index
    %16 = vector.load %arg6[%c0_11, %c0_12] : memref<16x128xf32, #tpu.memory_space<vmem>>, vector<16x128xf32>
    tpu.vector_store %arg6[%c0_11, %c0_12], %15 {strides = array<i32>} : memref<16x128xf32, #tpu.memory_space<vmem>>, vector<16x128xf32>,
    return
  }
  func.func @transform_0(%arg0: i32) -> (i32, i32) {
    %c0_i32 = arith.constant 0 : i32
    %c0_i32_0 = arith.constant 0 : i32
    return %arg0, %c0_i32 : i32, i32
  }
  func.func @transform_1(%arg0: i32) -> (i32, i32) {
    %c0_i32 = arith.constant 0 : i32
    %c0_i32_0 = arith.constant 0 : i32
    %c0_i32_1 = arith.constant 0 : i32
    return %c0_i32, %c0_i32_0 : i32, i32
  }
  func.func @transform_2(%arg0: i32) -> (i32, i32) {
    %c0_i32 = arith.constant 0 : i32
    %c0_i32_0 = arith.constant 0 : i32
    %c0_i32_1 = arith.constant 0 : i32
    return %c0_i32, %c0_i32_0 : i32, i32
  }
  func.func @transform_3(%arg0: i32) -> (i32, i32) {
    %c0_i32 = arith.constant 0 : i32
    %c0_i32_0 = arith.constant 0 : i32
    %c0_i32_1 = arith.constant 0 : i32
    return %c0_i32, %c0_i32_0 : i32, i32
  }
  func.func @transform_4(%arg0: i32) -> (i32, i32) {
    %c0_i32 = arith.constant 0 : i32
    %c0_i32_0 = arith.constant 0 : i32
    %c0_i32_1 = arith.constant 0 : i32
    return %c0_i32, %c0_i32_0 : i32, i32
  }
  func.func @transform_5(%arg0: i32) -> (i32, i32) {
    %c0_i32 = arith.constant 0 : i32
    %c0_i32_0 = arith.constant 0 : i32
    return %arg0, %c0_i32 : i32, i32
  }
}

</mosaic_0001>

<bundles_post_ra>
// kernel: tpu_custom_call.1
= control target key start
LH: loop header
LB: loop body
LE: loop exit
PB: predicated region body
PF: predicated region fallthrough
CT: control target
= control target key end

     0   :  { %10 = vsyncpa [#allocation3], 0  ;;  %s516_s0 = inlined_call_operand.hbm [shape: f32[16,128], index: 0, kind: input, shape index: {}]   ;;  %s517_s1 = inlined_call_operand.hbm [shape: bf16[128,128], index: 1, kind: input, shape index: {}]   ;;  %s518_s2 = inlined_call_operand.vmem [shape: f32[1,128], index: 2, kind: input, shape index: {}]   ;;  %s519_s3 = inlined_call_operand.hbm [shape: bf16[128,128], index: 3, kind: input, shape index: {}]   ;;  %s520_s4 = inlined_call_operand.vmem [shape: f32[1,128], index: 4, kind: input, shape index: {}]   ;;  %s521_s5 = inlined_call_operand.hbm [shape: f32[16,128], index: 5, kind: output, shape index: {}]  }
   0x1   :  { %11 = vsyncpa [#allocation6], 0  ;;  %s30_s20 = sshll.u32 %s517_s1, 4  ;;  %s31_s20 = int_to_ptr.hbm [resolvable:$true] %s30_s20 }
   0x2   :  { %12 = vsyncpa [#allocation4], 0  ;;  %s454_s21 = smov [#allocation5]   ;;  %s17_s25 = sshll.u32 %s516_s0, 4  ;;  %s18_s25 = int_to_ptr.hbm [resolvable:$true] %s17_s25 }
   0x3   :  { %s32_s22 = sshll.u32 %s454_s21, 4  ;;  %s455_s26 = smov 64   ;;  %s33_s22 = int_to_ptr.vmem [resolvable:$true] %s32_s22 }
   0x4   :  { %s456_s27 = smov 4   ;;  %s457_s28 = smov [#allocation2]  }
   0x5   :  { %38 = dma.hbm_to_vmem [thread:$0]  %s31_s20, 1024, %s33_s22, [#allocation6], %s455_s26, %s455_s26, %s456_s27  }
   0x6   :  { %s19_s29 = sshll.u32 %s457_s28, 4  ;;  %s458_s30 = smov 128   ;;  %s20_s29 = int_to_ptr.vmem [resolvable:$true] %s19_s29 }
   0x7   :  { %s459_s6 = smov 8   ;;  %s45_s8 = sshll.u32 %s519_s3, 4  ;;  %s46_s8 = int_to_ptr.hbm [resolvable:$true] %s45_s8 }
   0x8   :  { %25 = dma.hbm_to_vmem [thread:$0]  %s18_s25, 256, %s20_s29, [#allocation3], %s458_s30, %s458_s30, %s459_s6  }
   0x9   :  { %s460_s9 = smov [#allocation7]  }
   0xa   :  { %s47_s0 = sshll.u32 %s460_s9, 4  ;;  %s48_s0 = int_to_ptr.vmem [resolvable:$true] %s47_s0 }
   0xb   :  { %53 = dma.hbm_to_vmem [thread:$0]  %s46_s8, 1024, %s48_s0, [#allocation6], %s455_s26, %s455_s26, %s456_s27  }
   0xc   :  { %448 = dma.done.wait [#allocation3], 256  }
   0xd   :  { %449 = vsyncadd [#allocation3], 4294967040 }
   0xe   :  { %450 = dma.done.wait [#allocation6], 2048  }
   0xf   :  { %451 = vsyncadd [#allocation6], 4294965248  ;;  %v333_v0 = vld [vmem:[#allocation5 + $0x38] sm:$0xff]  ;;  %v332_v1 = vld [vmem:[#allocation5 + $0x30] sm:$0xff]  ;;  %s461_s13 = smov [#allocation8]   ;;  %s248_s16 = sshll.u32 %s521_s5, 4  ;;  %s249_s16 = int_to_ptr.hbm [resolvable:$true] %s248_s16 }
  0x10   :  { %139 = vmatpush.bf16.msra.mxu0 %v333_v0  ;;  %v341_v2 = vld [vmem:[#allocation7 + $0x38] sm:$0xff]  ;;  %v340_v3 = vld [vmem:[#allocation7 + $0x30] sm:$0xff]  ;;  %v331_v4 = vld [vmem:[#allocation5 + $0x28] sm:$0xff]  ;;  %s246_s14 = sshll.u32 %s461_s13, 4  ;;  %s247_s14 = int_to_ptr.vmem [resolvable:$true] %s246_s14 }
  0x11   :  { %224 = vmatpush.bf16.msra.mxu1 %v341_v2  ;;  %v339_v5 = vld [vmem:[#allocation7 + $0x28] sm:$0xff]  ;;  %v330_v6 = vld [vmem:[#allocation5 + $0x20] sm:$0xff]  ;;  %v329_v8 = vld [vmem:[#allocation5 + $0x18] sm:$0xff] }
  0x12   :  { %v338_v7 = vld [vmem:[#allocation7 + $0x20] sm:$0xff]  ;;  %v328_v9 = vld [vmem:[#allocation5 + $0x10] sm:$0xff]  ;;  %v327_v10 = vld [vmem:[#allocation5 + $0x8] sm:$0xff] }
  0x13   :  { %v326_v11 = vld [vmem:[#allocation5] sm:$0xff]  ;;  %v68_v12 = vld [vmem:[#allocation2] sm:$0xff]  ;;  %v69_v13 = vld [vmem:[#allocation2 + $0x8] sm:$0xff] }
  0x14   :  { %140 = vmatpush.bf16.msra.mxu0 %v332_v1  ;;  %v70_v14 = vpack.c.bf16 %v69_v13, %v68_v12  ;;  %v337_v15 = vld [vmem:[#allocation7 + $0x18] sm:$0xff]  ;;  %v336_v16 = vld [vmem:[#allocation7 + $0x10] sm:$0xff]  ;;  %v335_v17 = vld [vmem:[#allocation7 + $0x8] sm:$0xff] }
  0x15   :  { %225 = vmatpush.bf16.msra.mxu1 %v340_v3  ;;  %v334_v18 = vld [vmem:[#allocation7] sm:$0xff]  ;;  %v350_v20 = vld [vmem:[%s518_s2] ss:$0 sm:$0xff] }
  0x16   :  { %v351_v27 = vld [vmem:[%s520_s4] ss:$0 sm:$0xff] }
  0x18   :  { %141 = vmatpush.bf16.msra.mxu0 %v331_v4 }
  0x19   :  { %226 = vmatpush.bf16.msra.mxu1 %v339_v5 }
  0x1c   :  { %142 = vmatpush.bf16.msra.mxu0 %v330_v6 }
  0x1d   :  { %227 = vmatpush.bf16.msra.mxu1 %v338_v7 }
  0x20   :  { %143 = vmatpush.bf16.msra.mxu0 %v329_v8 }
  0x21   :  { %228 = vmatpush.bf16.msra.mxu1 %v337_v15 }
  0x24   :  { %144 = vmatpush.bf16.msra.mxu0 %v328_v9 }
  0x25   :  { %229 = vmatpush.bf16.msra.mxu1 %v336_v16 }
  0x28   :  { %145 = vmatpush.bf16.msra.mxu0 %v327_v10 }
  0x29   :  { %230 = vmatpush.bf16.msra.mxu1 %v335_v17 }
  0x2c   :  { %146 = vmatpush.bf16.msra.mxu0 %v326_v11 }
  0x2d   :  { %231 = vmatpush.bf16.msra.mxu1 %v334_v18 }
  0x2f   :  { %147 = vmatmul.bf16.vlgmr.msra.gmra.mxu0 %v70_v14 }
  0xac   :  { %v148_v19 = vpop.f32.mrf.mxu0 }
  0xad   :  { %v149_v21 = vadd.f32 %v350_v20, %v148_v19 }
  0xaf   :  { %v153_v24 = vmax.f32 %v149_v21, 0.0 }
  0xb4   :  { %v150_v22 = vpop.f32.mrf.mxu0 }
  0xb5   :  { %v151_v23 = vadd.f32 %v350_v20, %v150_v22 }
  0xb7   :  { %v154_v25 = vmax.f32 %v151_v23, 0.0 }
  0xb9   :  { %v155_v26 = vpack.c.bf16 %v154_v25, %v153_v24 }
  0xbb   :  { %232 = vmatmul.bf16.vlgmr.msra.gmra.mxu1 %v155_v26 }
 0x138   :  { %v233_v28 = vpop.f32.mrf.mxu1 }
 0x139   :  { %v234_v29 = vadd.f32 %v351_v27, %v233_v28 }
 0x13b   :  { %v238_v30 = vadd.f32 %v234_v29, %v68_v12 }
 0x13d   :  { %240 = vst [vmem:[#allocation8] sm:$0xff] %v238_v30 }
 0x140   :  { %v235_v31 = vpop.f32.mrf.mxu1 }
 0x141   :  { %v236_v32 = vadd.f32 %v351_v27, %v235_v31 }
 0x143   :  { %v239_v33 = vadd.f32 %v236_v32, %v69_v13 }
 0x145   :  { %241 = vst [vmem:[#allocation8 + $0x8] sm:$0xff] %v239_v33 }
 0x146   :  { %254 = dma.vmem_to_hbm [thread:$0]  %s247_s14, 256, %s249_s16, [#allocation4], %s458_s30, %s458_s30, %s459_s6  }
 0x147   :  { %452 = dma.done.wait [#allocation4], 256  }
 0x148   :  { %453 = vsyncadd [#allocation4], 4294967040 }
 0x149   :  { %259 = vsyncpa [#allocation3], 1 }
 0x14a   :  { %260 = vsyncpa [#allocation6], 1 }
 0x14b   :  { %261 = vsyncpa [#allocation4], 1 }

</bundles_post_ra>
